<compile_context>
chip_gen: v7x
topology: tpu7x:2x2x1
jax: 0.10.0
libtpu: 0.0.40
codegen_flags: <defaults>
</compile_context>

<pallas_src>
import functools

import jax
import jax.numpy as jnp
from jax import lax
from jax.experimental import pallas as pl
from jax.experimental.pallas import tpu as pltpu


def _round_up(x, m):
    return (x + m - 1) // m * m


def _reg_loss_kernel(ei_ref, ejt_ref, o_ref, min_ref, *, S, D, TILE_I, TILE_J):
    i = pl.program_id(0)          # i-tile (rows / "query" speakers)
    j = pl.program_id(1)          # j-tile (cols / "other" speakers), reduction axis

    # Init the running per-row min on the first j-tile.
    @pl.when(j == 0)
    def _():
        min_ref[...] = jnp.full((TILE_I, 1), jnp.finfo(jnp.float32).max,
                                dtype=jnp.float32)

    # dist[a, b] = sum_d |E_i[a, d] - E_jT[d, b]|, accumulated over d.
    # D is a small static int -> fully unrolled; every step is a plain
    # (TILE_I, TILE_J) VPU subtract/abs/add, no XLU lane reductions.
    acc = jnp.zeros((TILE_I, TILE_J), jnp.float32)
    for d in range(D):
        col = ei_ref[:, d:d + 1]        # (TILE_I, 1)
        row = ejt_ref[d:d + 1, :]       # (1, TILE_J)
        acc = acc + jnp.abs(col - row)

    # Global row / col indices of this tile (diagonal + padding masks are
    # per-tile only; no full (S, S) iotas are ever built).
    row_g = i * TILE_I + lax.broadcasted_iota(jnp.int32, (TILE_I, TILE_J), 0)
    col_g = j * TILE_J + lax.broadcasted_iota(jnp.int32, (TILE_I, TILE_J), 1)
    acc = jnp.where(row_g == col_g, jnp.float32(1000000.0), acc)   # diag mask (matches ref)
    acc = jnp.where(col_g >= S, jnp.finfo(jnp.float32).max, acc)   # padded cols never win

    # Per-row min over this j-tile (single lane reduce), fold into running min.
    tile_min = jnp.min(acc, axis=-1, keepdims=True)                # (TILE_I, 1)
    min_ref[...] = jnp.minimum(min_ref[...], tile_min)

    # Epilogue on the last j-tile: emit log(min) per row (EUP, free slot);
    # padded rows contribute 0 so the wrapper can just sum.
    @pl.when(j == pl.num_programs(1) - 1)
    def _():
        row_i = i * TILE_I + lax.broadcasted_iota(jnp.int32, (TILE_I, 1), 0)
        logm = jnp.log(min_ref[...])
        o_ref[...] = jnp.where(row_i < S, logm, jnp.float32(0.0))


def regularization_loss(E, *, tile_i=128, tile_j=128):
    """E: (S, D) float -> scalar float32 loss (same semantics as the PyTorch module)."""
    E = E.astype(jnp.float32)
    S, D = E.shape

    # Adapt the i tile for tiny tables; j tile stays lane-dense (128).
    tile_i = min(tile_i, _round_up(S, 8))
    spi = _round_up(S, tile_i)           # padded rows for the i operand / output
    spj = _round_up(S, tile_j)           # padded cols for the transposed operand

    e_rows = jnp.pad(E, ((0, spi - S), (0, 0)))          # (SPI, D)
    e_cols_t = jnp.pad(E, ((0, spj - S), (0, 0))).T      # (D, SPJ), j on lanes

    grid = (spi // tile_i, spj // tile_j)

    kernel = functools.partial(_reg_loss_kernel, S=S, D=D,
                               TILE_I=tile_i, TILE_J=tile_j)

    log_min = pl.pallas_call(
        kernel,
        out_shape=jax.ShapeDtypeStruct((spi, 1), jnp.float32),
        grid_spec=pltpu.PrefetchScalarGridSpec(
            num_scalar_prefetch=0,
            grid=grid,
            in_specs=[
                pl.BlockSpec((tile_i, D), lambda i, j: (i, 0)),   # E rows
                pl.BlockSpec((D, tile_j), lambda i, j: (0, j)),   # E^T cols
            ],
            out_specs=pl.BlockSpec((tile_i, 1), lambda i, j: (i, 0)),
            scratch_shapes=[pltpu.VMEM((tile_i, 1), jnp.float32)],
        ),
        compiler_params=pltpu.CompilerParams(
            dimension_semantics=("parallel", "arbitrary")),
    )(e_rows, e_cols_t)

    # Tiny final reduction over the S valid rows (padded rows were written as 0).
    return -jnp.sum(log_min) / jnp.float32(S)


def _reference(E):
    E = E.astype(jnp.float32)
    dist = jnp.sum(jnp.abs(E[:, None, :] - E[None, :, :]), axis=-1)
    dist = jnp.where(jnp.eye(E.shape[0], dtype=bool), 1e6, dist)
    return -jnp.mean(jnp.log(jnp.min(dist, axis=-1)))


if __name__ == "__main__":
    key = jax.random.PRNGKey(0)

    # Shipped-size case: 8 speakers, 32-dim embeddings (single grid step).
    S, D = 8, 32
    E = jax.random.normal(key, (S, D), dtype=jnp.float32)
    loss = jax.block_until_ready(regularization_loss(E))
    ref = jax.block_until_ready(_reference(E))
    assert jnp.allclose(loss, ref, rtol=1e-5, atol=1e-5), (loss, ref)

    # Non-divisible size to exercise the tiled grid + padding masks (grid 2x2).
    S2, D2 = 200, 32
    E2 = jax.random.normal(jax.random.PRNGKey(0), (S2, D2), dtype=jnp.float32)
    loss2 = jax.block_until_ready(regularization_loss(E2))
    ref2 = jax.block_until_ready(_reference(E2))
    assert jnp.allclose(loss2, ref2, rtol=1e-5, atol=1e-5), (loss2, ref2)

    print("KERNEL_OK")
</pallas_src>

<mosaic_0001>
module attributes {stable_mosaic.version = 11 : i64} {
  func.func @_reg_loss_kernel(%arg0: i32, %arg1: i32, %arg2: memref<8x32xf32, #tpu.memory_space<vmem>>, %arg3: memref<32x128xf32, #tpu.memory_space<vmem>>, %arg4: memref<8x1xf32, #tpu.memory_space<vmem>>, %arg5: memref<8x1xf32, #tpu.memory_space<vmem>>) attributes {dimension_semantics = [#tpu.dimension_semantics<parallel>, #tpu.dimension_semantics<arbitrary>], iteration_bounds = array<i64: 1, 1>, scalar_prefetch = 0 : i64, scratch_operands = 1 : i64, tpu.core_type = #tpu.core_type<tc>, window_params = [{transform_indices = @transform_0, window_bounds = array<i64: 8, 32>}, {transform_indices = @transform_1, window_bounds = array<i64: 32, 128>}, {transform_indices = @transform_2, window_bounds = array<i64: 8, 1>}]} {
    %c0_i32 = arith.constant 0 : i32
    %0 = arith.cmpi eq, %arg1, %c0_i32 : i32
    %1 = arith.extui %0 : i1 to i32
    %c0_i32_0 = arith.constant 0 : i32
    %2 = arith.cmpi ne, %1, %c0_i32_0 : i32
    scf.if %2 {
      %cst_107 = arith.constant 3.40282347E+38 : f32
      %251 = vector.broadcast %cst_107 : f32 to vector<8x1xf32>
      %c0_108 = arith.constant 0 : index
      %c0_109 = arith.constant 0 : index
      %252 = vector.load %arg5[%c0_108, %c0_109] : memref<8x1xf32, #tpu.memory_space<vmem>>, vector<8x1xf32>
      tpu.vector_store %arg5[%c0_108, %c0_109], %251 {strides = array<i32>} : memref<8x1xf32, #tpu.memory_space<vmem>>, vector<8x1xf32>,
    } else {
    }
    %cst = arith.constant 0.000000e+00 : f32
    %3 = vector.broadcast %cst : f32 to vector<8x128xf32>
    %c0 = arith.constant 0 : index
    %c0_1 = arith.constant 0 : index
    %4 = vector.load %arg2[%c0, %c0_1] : memref<8x32xf32, #tpu.memory_space<vmem>>, vector<8x1xf32>
    %c0_2 = arith.constant 0 : index
    %c0_3 = arith.constant 0 : index
    %5 = vector.load %arg3[%c0_2, %c0_3] : memref<32x128xf32, #tpu.memory_space<vmem>>, vector<1x128xf32>
    %6 = vector.broadcast %4 : vector<8x1xf32> to vector<8x128xf32>
    %7 = vector.broadcast %5 : vector<1x128xf32> to vector<8x128xf32>
    %8 = arith.subf %6, %7 : vector<8x128xf32>
    %9 = math.absf %8 : vector<8x128xf32>
    %10 = arith.addf %3, %9 : vector<8x128xf32>
    %c0_4 = arith.constant 0 : index
    %c1 = arith.constant 1 : index
    %11 = vector.load %arg2[%c0_4, %c1] : memref<8x32xf32, #tpu.memory_space<vmem>>, vector<8x1xf32>
    %c1_5 = arith.constant 1 : index
    %c0_6 = arith.constant 0 : index
    %12 = vector.load %arg3[%c1_5, %c0_6] : memref<32x128xf32, #tpu.memory_space<vmem>>, vector<1x128xf32>
    %13 = vector.broadcast %11 : vector<8x1xf32> to vector<8x128xf32>
    %14 = vector.broadcast %12 : vector<1x128xf32> to vector<8x128xf32>
    %15 = arith.subf %13, %14 : vector<8x128xf32>
    %16 = math.absf %15 : vector<8x128xf32>
    %17 = arith.addf %10, %16 : vector<8x128xf32>
    %c0_7 = arith.constant 0 : index
    %c2 = arith.constant 2 : index
    %18 = vector.load %arg2[%c0_7, %c2] : memref<8x32xf32, #tpu.memory_space<vmem>>, vector<8x1xf32>
    %c2_8 = arith.constant 2 : index
    %c0_9 = arith.constant 0 : index
    %19 = vector.load %arg3[%c2_8, %c0_9] : memref<32x128xf32, #tpu.memory_space<vmem>>, vector<1x128xf32>
    %20 = vector.broadcast %18 : vector<8x1xf32> to vector<8x128xf32>
    %21 = vector.broadcast %19 : vector<1x128xf32> to vector<8x128xf32>
    %22 = arith.subf %20, %21 : vector<8x128xf32>
    %23 = math.absf %22 : vector<8x128xf32>
    %24 = arith.addf %17, %23 : vector<8x128xf32>
    %c0_10 = arith.constant 0 : index
    %c3 = arith.constant 3 : index
    %25 = vector.load %arg2[%c0_10, %c3] : memref<8x32xf32, #tpu.memory_space<vmem>>, vector<8x1xf32>
    %c3_11 = arith.constant 3 : index
    %c0_12 = arith.constant 0 : index
    %26 = vector.load %arg3[%c3_11, %c0_12] : memref<32x128xf32, #tpu.memory_space<vmem>>, vector<1x128xf32>
    %27 = vector.broadcast %25 : vector<8x1xf32> to vector<8x128xf32>
    %28 = vector.broadcast %26 : vector<1x128xf32> to vector<8x128xf32>
    %29 = arith.subf %27, %28 : vector<8x128xf32>
    %30 = math.absf %29 : vector<8x128xf32>
    %31 = arith.addf %24, %30 : vector<8x128xf32>
    %c0_13 = arith.constant 0 : index
    %c4 = arith.constant 4 : index
    %32 = vector.load %arg2[%c0_13, %c4] : memref<8x32xf32, #tpu.memory_space<vmem>>, vector<8x1xf32>
    %c4_14 = arith.constant 4 : index
    %c0_15 = arith.constant 0 : index
    %33 = vector.load %arg3[%c4_14, %c0_15] : memref<32x128xf32, #tpu.memory_space<vmem>>, vector<1x128xf32>
    %34 = vector.broadcast %32 : vector<8x1xf32> to vector<8x128xf32>
    %35 = vector.broadcast %33 : vector<1x128xf32> to vector<8x128xf32>
    %36 = arith.subf %34, %35 : vector<8x128xf32>
    %37 = math.absf %36 : vector<8x128xf32>
    %38 = arith.addf %31, %37 : vector<8x128xf32>
    %c0_16 = arith.constant 0 : index
    %c5 = arith.constant 5 : index
    %39 = vector.load %arg2[%c0_16, %c5] : memref<8x32xf32, #tpu.memory_space<vmem>>, vector<8x1xf32>
    %c5_17 = arith.constant 5 : index
    %c0_18 = arith.constant 0 : index
    %40 = vector.load %arg3[%c5_17, %c0_18] : memref<32x128xf32, #tpu.memory_space<vmem>>, vector<1x128xf32>
    %41 = vector.broadcast %39 : vector<8x1xf32> to vector<8x128xf32>
    %42 = vector.broadcast %40 : vector<1x128xf32> to vector<8x128xf32>
    %43 = arith.subf %41, %42 : vector<8x128xf32>
    %44 = math.absf %43 : vector<8x128xf32>
    %45 = arith.addf %38, %44 : vector<8x128xf32>
    %c0_19 = arith.constant 0 : index
    %c6 = arith.constant 6 : index
    %46 = vector.load %arg2[%c0_19, %c6] : memref<8x32xf32, #tpu.memory_space<vmem>>, vector<8x1xf32>
    %c6_20 = arith.constant 6 : index
    %c0_21 = arith.constant 0 : index
    %47 = vector.load %arg3[%c6_20, %c0_21] : memref<32x128xf32, #tpu.memory_space<vmem>>, vector<1x128xf32>
    %48 = vector.broadcast %46 : vector<8x1xf32> to vector<8x128xf32>
    %49 = vector.broadcast %47 : vector<1x128xf32> to vector<8x128xf32>
    %50 = arith.subf %48, %49 : vector<8x128xf32>
    %51 = math.absf %50 : vector<8x128xf32>
    %52 = arith.addf %45, %51 : vector<8x128xf32>
    %c0_22 = arith.constant 0 : index
    %c7 = arith.constant 7 : index
    %53 = vector.load %arg2[%c0_22, %c7] : memref<8x32xf32, #tpu.memory_space<vmem>>, vector<8x1xf32>
    %c7_23 = arith.constant 7 : index
    %c0_24 = arith.constant 0 : index
    %54 = vector.load %arg3[%c7_23, %c0_24] : memref<32x128xf32, #tpu.memory_space<vmem>>, vector<1x128xf32>
    %55 = vector.broadcast %53 : vector<8x1xf32> to vector<8x128xf32>
    %56 = vector.broadcast %54 : vector<1x128xf32> to vector<8x128xf32>
    %57 = arith.subf %55, %56 : vector<8x128xf32>
    %58 = math.absf %57 : vector<8x128xf32>
    %59 = arith.addf %52, %58 : vector<8x128xf32>
    %c0_25 = arith.constant 0 : index
    %c8 = arith.constant 8 : index
    %60 = vector.load %arg2[%c0_25, %c8] : memref<8x32xf32, #tpu.memory_space<vmem>>, vector<8x1xf32>
    %c8_26 = arith.constant 8 : index
    %c0_27 = arith.constant 0 : index
    %61 = vector.load %arg3[%c8_26, %c0_27] : memref<32x128xf32, #tpu.memory_space<vmem>>, vector<1x128xf32>
    %62 = vector.broadcast %60 : vector<8x1xf32> to vector<8x128xf32>
    %63 = vector.broadcast %61 : vector<1x128xf32> to vector<8x128xf32>
    %64 = arith.subf %62, %63 : vector<8x128xf32>
    %65 = math.absf %64 : vector<8x128xf32>
    %66 = arith.addf %59, %65 : vector<8x128xf32>
    %c0_28 = arith.constant 0 : index
    %c9 = arith.constant 9 : index
    %67 = vector.load %arg2[%c0_28, %c9] : memref<8x32xf32, #tpu.memory_space<vmem>>, vector<8x1xf32>
    %c9_29 = arith.constant 9 : index
    %c0_30 = arith.constant 0 : index
    %68 = vector.load %arg3[%c9_29, %c0_30] : memref<32x128xf32, #tpu.memory_space<vmem>>, vector<1x128xf32>
    %69 = vector.broadcast %67 : vector<8x1xf32> to vector<8x128xf32>
    %70 = vector.broadcast %68 : vector<1x128xf32> to vector<8x128xf32>
    %71 = arith.subf %69, %70 : vector<8x128xf32>
    %72 = math.absf %71 : vector<8x128xf32>
    %73 = arith.addf %66, %72 : vector<8x128xf32>
    %c0_31 = arith.constant 0 : index
    %c10 = arith.constant 10 : index
    %74 = vector.load %arg2[%c0_31, %c10] : memref<8x32xf32, #tpu.memory_space<vmem>>, vector<8x1xf32>
    %c10_32 = arith.constant 10 : index
    %c0_33 = arith.constant 0 : index
    %75 = vector.load %arg3[%c10_32, %c0_33] : memref<32x128xf32, #tpu.memory_space<vmem>>, vector<1x128xf32>
    %76 = vector.broadcast %74 : vector<8x1xf32> to vector<8x128xf32>
    %77 = vector.broadcast %75 : vector<1x128xf32> to vector<8x128xf32>
    %78 = arith.subf %76, %77 : vector<8x128xf32>
    %79 = math.absf %78 : vector<8x128xf32>
    %80 = arith.addf %73, %79 : vector<8x128xf32>
    %c0_34 = arith.constant 0 : index
    %c11 = arith.constant 11 : index
    %81 = vector.load %arg2[%c0_34, %c11] : memref<8x32xf32, #tpu.memory_space<vmem>>, vector<8x1xf32>
    %c11_35 = arith.constant 11 : index
    %c0_36 = arith.constant 0 : index
    %82 = vector.load %arg3[%c11_35, %c0_36] : memref<32x128xf32, #tpu.memory_space<vmem>>, vector<1x128xf32>
    %83 = vector.broadcast %81 : vector<8x1xf32> to vector<8x128xf32>
    %84 = vector.broadcast %82 : vector<1x128xf32> to vector<8x128xf32>
    %85 = arith.subf %83, %84 : vector<8x128xf32>
    %86 = math.absf %85 : vector<8x128xf32>
    %87 = arith.addf %80, %86 : vector<8x128xf32>
    %c0_37 = arith.constant 0 : index
    %c12 = arith.constant 12 : index
    %88 = vector.load %arg2[%c0_37, %c12] : memref<8x32xf32, #tpu.memory_space<vmem>>, vector<8x1xf32>
    %c12_38 = arith.constant 12 : index
    %c0_39 = arith.constant 0 : index
    %89 = vector.load %arg3[%c12_38, %c0_39] : memref<32x128xf32, #tpu.memory_space<vmem>>, vector<1x128xf32>
    %90 = vector.broadcast %88 : vector<8x1xf32> to vector<8x128xf32>
    %91 = vector.broadcast %89 : vector<1x128xf32> to vector<8x128xf32>
    %92 = arith.subf %90, %91 : vector<8x128xf32>
    %93 = math.absf %92 : vector<8x128xf32>
    %94 = arith.addf %87, %93 : vector<8x128xf32>
    %c0_40 = arith.constant 0 : index
    %c13 = arith.constant 13 : index
    %95 = vector.load %arg2[%c0_40, %c13] : memref<8x32xf32, #tpu.memory_space<vmem>>, vector<8x1xf32>
    %c13_41 = arith.constant 13 : index
    %c0_42 = arith.constant 0 : index
    %96 = vector.load %arg3[%c13_41, %c0_42] : memref<32x128xf32, #tpu.memory_space<vmem>>, vector<1x128xf32>
    %97 = vector.broadcast %95 : vector<8x1xf32> to vector<8x128xf32>
    %98 = vector.broadcast %96 : vector<1x128xf32> to vector<8x128xf32>
    %99 = arith.subf %97, %98 : vector<8x128xf32>
    %100 = math.absf %99 : vector<8x128xf32>
    %101 = arith.addf %94, %100 : vector<8x128xf32>
    %c0_43 = arith.constant 0 : index
    %c14 = arith.constant 14 : index
    %102 = vector.load %arg2[%c0_43, %c14] : memref<8x32xf32, #tpu.memory_space<vmem>>, vector<8x1xf32>
    %c14_44 = arith.constant 14 : index
    %c0_45 = arith.constant 0 : index
    %103 = vector.load %arg3[%c14_44, %c0_45] : memref<32x128xf32, #tpu.memory_space<vmem>>, vector<1x128xf32>
    %104 = vector.broadcast %102 : vector<8x1xf32> to vector<8x128xf32>
    %105 = vector.broadcast %103 : vector<1x128xf32> to vector<8x128xf32>
    %106 = arith.subf %104, %105 : vector<8x128xf32>
    %107 = math.absf %106 : vector<8x128xf32>
    %108 = arith.addf %101, %107 : vector<8x128xf32>
    %c0_46 = arith.constant 0 : index
    %c15 = arith.constant 15 : index
    %109 = vector.load %arg2[%c0_46, %c15] : memref<8x32xf32, #tpu.memory_space<vmem>>, vector<8x1xf32>
    %c15_47 = arith.constant 15 : index
    %c0_48 = arith.constant 0 : index
    %110 = vector.load %arg3[%c15_47, %c0_48] : memref<32x128xf32, #tpu.memory_space<vmem>>, vector<1x128xf32>
    %111 = vector.broadcast %109 : vector<8x1xf32> to vector<8x128xf32>
    %112 = vector.broadcast %110 : vector<1x128xf32> to vector<8x128xf32>
    %113 = arith.subf %111, %112 : vector<8x128xf32>
    %114 = math.absf %113 : vector<8x128xf32>
    %115 = arith.addf %108, %114 : vector<8x128xf32>
    %c0_49 = arith.constant 0 : index
    %c16 = arith.constant 16 : index
    %116 = vector.load %arg2[%c0_49, %c16] : memref<8x32xf32, #tpu.memory_space<vmem>>, vector<8x1xf32>
    %c16_50 = arith.constant 16 : index
    %c0_51 = arith.constant 0 : index
    %117 = vector.load %arg3[%c16_50, %c0_51] : memref<32x128xf32, #tpu.memory_space<vmem>>, vector<1x128xf32>
    %118 = vector.broadcast %116 : vector<8x1xf32> to vector<8x128xf32>
    %119 = vector.broadcast %117 : vector<1x128xf32> to vector<8x128xf32>
    %120 = arith.subf %118, %119 : vector<8x128xf32>
    %121 = math.absf %120 : vector<8x128xf32>
    %122 = arith.addf %115, %121 : vector<8x128xf32>
    %c0_52 = arith.constant 0 : index
    %c17 = arith.constant 17 : index
    %123 = vector.load %arg2[%c0_52, %c17] : memref<8x32xf32, #tpu.memory_space<vmem>>, vector<8x1xf32>
    %c17_53 = arith.constant 17 : index
    %c0_54 = arith.constant 0 : index
    %124 = vector.load %arg3[%c17_53, %c0_54] : memref<32x128xf32, #tpu.memory_space<vmem>>, vector<1x128xf32>
    %125 = vector.broadcast %123 : vector<8x1xf32> to vector<8x128xf32>
    %126 = vector.broadcast %124 : vector<1x128xf32> to vector<8x128xf32>
    %127 = arith.subf %125, %126 : vector<8x128xf32>
    %128 = math.absf %127 : vector<8x128xf32>
    %129 = arith.addf %122, %128 : vector<8x128xf32>
    %c0_55 = arith.constant 0 : index
    %c18 = arith.constant 18 : index
    %130 = vector.load %arg2[%c0_55, %c18] : memref<8x32xf32, #tpu.memory_space<vmem>>, vector<8x1xf32>
    %c18_56 = arith.constant 18 : index
    %c0_57 = arith.constant 0 : index
    %131 = vector.load %arg3[%c18_56, %c0_57] : memref<32x128xf32, #tpu.memory_space<vmem>>, vector<1x128xf32>
    %132 = vector.broadcast %130 : vector<8x1xf32> to vector<8x128xf32>
    %133 = vector.broadcast %131 : vector<1x128xf32> to vector<8x128xf32>
    %134 = arith.subf %132, %133 : vector<8x128xf32>
    %135 = math.absf %134 : vector<8x128xf32>
    %136 = arith.addf %129, %135 : vector<8x128xf32>
    %c0_58 = arith.constant 0 : index
    %c19 = arith.constant 19 : index
    %137 = vector.load %arg2[%c0_58, %c19] : memref<8x32xf32, #tpu.memory_space<vmem>>, vector<8x1xf32>
    %c19_59 = arith.constant 19 : index
    %c0_60 = arith.constant 0 : index
    %138 = vector.load %arg3[%c19_59, %c0_60] : memref<32x128xf32, #tpu.memory_space<vmem>>, vector<1x128xf32>
    %139 = vector.broadcast %137 : vector<8x1xf32> to vector<8x128xf32>
    %140 = vector.broadcast %138 : vector<1x128xf32> to vector<8x128xf32>
    %141 = arith.subf %139, %140 : vector<8x128xf32>
    %142 = math.absf %141 : vector<8x128xf32>
    %143 = arith.addf %136, %142 : vector<8x128xf32>
    %c0_61 = arith.constant 0 : index
    %c20 = arith.constant 20 : index
    %144 = vector.load %arg2[%c0_61, %c20] : memref<8x32xf32, #tpu.memory_space<vmem>>, vector<8x1xf32>
    %c20_62 = arith.constant 20 : index
    %c0_63 = arith.constant 0 : index
    %145 = vector.load %arg3[%c20_62, %c0_63] : memref<32x128xf32, #tpu.memory_space<vmem>>, vector<1x128xf32>
    %146 = vector.broadcast %144 : vector<8x1xf32> to vector<8x128xf32>
    %147 = vector.broadcast %145 : vector<1x128xf32> to vector<8x128xf32>
    %148 = arith.subf %146, %147 : vector<8x128xf32>
    %149 = math.absf %148 : vector<8x128xf32>
    %150 = arith.addf %143, %149 : vector<8x128xf32>
    %c0_64 = arith.constant 0 : index
    %c21 = arith.constant 21 : index
    %151 = vector.load %arg2[%c0_64, %c21] : memref<8x32xf32, #tpu.memory_space<vmem>>, vector<8x1xf32>
    %c21_65 = arith.constant 21 : index
    %c0_66 = arith.constant 0 : index
    %152 = vector.load %arg3[%c21_65, %c0_66] : memref<32x128xf32, #tpu.memory_space<vmem>>, vector<1x128xf32>
    %153 = vector.broadcast %151 : vector<8x1xf32> to vector<8x128xf32>
    %154 = vector.broadcast %152 : vector<1x128xf32> to vector<8x128xf32>
    %155 = arith.subf %153, %154 : vector<8x128xf32>
    %156 = math.absf %155 : vector<8x128xf32>
    %157 = arith.addf %150, %156 : vector<8x128xf32>
    %c0_67 = arith.constant 0 : index
    %c22 = arith.constant 22 : index
    %158 = vector.load %arg2[%c0_67, %c22] : memref<8x32xf32, #tpu.memory_space<vmem>>, vector<8x1xf32>
    %c22_68 = arith.constant 22 : index
    %c0_69 = arith.constant 0 : index
    %159 = vector.load %arg3[%c22_68, %c0_69] : memref<32x128xf32, #tpu.memory_space<vmem>>, vector<1x128xf32>
    %160 = vector.broadcast %158 : vector<8x1xf32> to vector<8x128xf32>
    %161 = vector.broadcast %159 : vector<1x128xf32> to vector<8x128xf32>
    %162 = arith.subf %160, %161 : vector<8x128xf32>
    %163 = math.absf %162 : vector<8x128xf32>
    %164 = arith.addf %157, %163 : vector<8x128xf32>
    %c0_70 = arith.constant 0 : index
    %c23 = arith.constant 23 : index
    %165 = vector.load %arg2[%c0_70, %c23] : memref<8x32xf32, #tpu.memory_space<vmem>>, vector<8x1xf32>
    %c23_71 = arith.constant 23 : index
    %c0_72 = arith.constant 0 : index
    %166 = vector.load %arg3[%c23_71, %c0_72] : memref<32x128xf32, #tpu.memory_space<vmem>>, vector<1x128xf32>
    %167 = vector.broadcast %165 : vector<8x1xf32> to vector<8x128xf32>
    %168 = vector.broadcast %166 : vector<1x128xf32> to vector<8x128xf32>
    %169 = arith.subf %167, %168 : vector<8x128xf32>
    %170 = math.absf %169 : vector<8x128xf32>
    %171 = arith.addf %164, %170 : vector<8x128xf32>
    %c0_73 = arith.constant 0 : index
    %c24 = arith.constant 24 : index
    %172 = vector.load %arg2[%c0_73, %c24] : memref<8x32xf32, #tpu.memory_space<vmem>>, vector<8x1xf32>
    %c24_74 = arith.constant 24 : index
    %c0_75 = arith.constant 0 : index
    %173 = vector.load %arg3[%c24_74, %c0_75] : memref<32x128xf32, #tpu.memory_space<vmem>>, vector<1x128xf32>
    %174 = vector.broadcast %172 : vector<8x1xf32> to vector<8x128xf32>
    %175 = vector.broadcast %173 : vector<1x128xf32> to vector<8x128xf32>
    %176 = arith.subf %174, %175 : vector<8x128xf32>
    %177 = math.absf %176 : vector<8x128xf32>
    %178 = arith.addf %171, %177 : vector<8x128xf32>
    %c0_76 = arith.constant 0 : index
    %c25 = arith.constant 25 : index
    %179 = vector.load %arg2[%c0_76, %c25] : memref<8x32xf32, #tpu.memory_space<vmem>>, vector<8x1xf32>
    %c25_77 = arith.constant 25 : index
    %c0_78 = arith.constant 0 : index
    %180 = vector.load %arg3[%c25_77, %c0_78] : memref<32x128xf32, #tpu.memory_space<vmem>>, vector<1x128xf32>
    %181 = vector.broadcast %179 : vector<8x1xf32> to vector<8x128xf32>
    %182 = vector.broadcast %180 : vector<1x128xf32> to vector<8x128xf32>
    %183 = arith.subf %181, %182 : vector<8x128xf32>
    %184 = math.absf %183 : vector<8x128xf32>
    %185 = arith.addf %178, %184 : vector<8x128xf32>
    %c0_79 = arith.constant 0 : index
    %c26 = arith.constant 26 : index
    %186 = vector.load %arg2[%c0_79, %c26] : memref<8x32xf32, #tpu.memory_space<vmem>>, vector<8x1xf32>
    %c26_80 = arith.constant 26 : index
    %c0_81 = arith.constant 0 : index
    %187 = vector.load %arg3[%c26_80, %c0_81] : memref<32x128xf32, #tpu.memory_space<vmem>>, vector<1x128xf32>
    %188 = vector.broadcast %186 : vector<8x1xf32> to vector<8x128xf32>
    %189 = vector.broadcast %187 : vector<1x128xf32> to vector<8x128xf32>
    %190 = arith.subf %188, %189 : vector<8x128xf32>
    %191 = math.absf %190 : vector<8x128xf32>
    %192 = arith.addf %185, %191 : vector<8x128xf32>
    %c0_82 = arith.constant 0 : index
    %c27 = arith.constant 27 : index
    %193 = vector.load %arg2[%c0_82, %c27] : memref<8x32xf32, #tpu.memory_space<vmem>>, vector<8x1xf32>
    %c27_83 = arith.constant 27 : index
    %c0_84 = arith.constant 0 : index
    %194 = vector.load %arg3[%c27_83, %c0_84] : memref<32x128xf32, #tpu.memory_space<vmem>>, vector<1x128xf32>
    %195 = vector.broadcast %193 : vector<8x1xf32> to vector<8x128xf32>
    %196 = vector.broadcast %194 : vector<1x128xf32> to vector<8x128xf32>
    %197 = arith.subf %195, %196 : vector<8x128xf32>
    %198 = math.absf %197 : vector<8x128xf32>
    %199 = arith.addf %192, %198 : vector<8x128xf32>
    %c0_85 = arith.constant 0 : index
    %c28 = arith.constant 28 : index
    %200 = vector.load %arg2[%c0_85, %c28] : memref<8x32xf32, #tpu.memory_space<vmem>>, vector<8x1xf32>
    %c28_86 = arith.constant 28 : index
    %c0_87 = arith.constant 0 : index
    %201 = vector.load %arg3[%c28_86, %c0_87] : memref<32x128xf32, #tpu.memory_space<vmem>>, vector<1x128xf32>
    %202 = vector.broadcast %200 : vector<8x1xf32> to vector<8x128xf32>
    %203 = vector.broadcast %201 : vector<1x128xf32> to vector<8x128xf32>
    %204 = arith.subf %202, %203 : vector<8x128xf32>
    %205 = math.absf %204 : vector<8x128xf32>
    %206 = arith.addf %199, %205 : vector<8x128xf32>
    %c0_88 = arith.constant 0 : index
    %c29 = arith.constant 29 : index
    %207 = vector.load %arg2[%c0_88, %c29] : memref<8x32xf32, #tpu.memory_space<vmem>>, vector<8x1xf32>
    %c29_89 = arith.constant 29 : index
    %c0_90 = arith.constant 0 : index
    %208 = vector.load %arg3[%c29_89, %c0_90] : memref<32x128xf32, #tpu.memory_space<vmem>>, vector<1x128xf32>
    %209 = vector.broadcast %207 : vector<8x1xf32> to vector<8x128xf32>
    %210 = vector.broadcast %208 : vector<1x128xf32> to vector<8x128xf32>
    %211 = arith.subf %209, %210 : vector<8x128xf32>
    %212 = math.absf %211 : vector<8x128xf32>
    %213 = arith.addf %206, %212 : vector<8x128xf32>
    %c0_91 = arith.constant 0 : index
    %c30 = arith.constant 30 : index
    %214 = vector.load %arg2[%c0_91, %c30] : memref<8x32xf32, #tpu.memory_space<vmem>>, vector<8x1xf32>
    %c30_92 = arith.constant 30 : index
    %c0_93 = arith.constant 0 : index
    %215 = vector.load %arg3[%c30_92, %c0_93] : memref<32x128xf32, #tpu.memory_space<vmem>>, vector<1x128xf32>
    %216 = vector.broadcast %214 : vector<8x1xf32> to vector<8x128xf32>
    %217 = vector.broadcast %215 : vector<1x128xf32> to vector<8x128xf32>
    %218 = arith.subf %216, %217 : vector<8x128xf32>
    %219 = math.absf %218 : vector<8x128xf32>
    %220 = arith.addf %213, %219 : vector<8x128xf32>
    %c0_94 = arith.constant 0 : index
    %c31 = arith.constant 31 : index
    %221 = vector.load %arg2[%c0_94, %c31] : memref<8x32xf32, #tpu.memory_space<vmem>>, vector<8x1xf32>
    %c31_95 = arith.constant 31 : index
    %c0_96 = arith.constant 0 : index
    %222 = vector.load %arg3[%c31_95, %c0_96] : memref<32x128xf32, #tpu.memory_space<vmem>>, vector<1x128xf32>
    %223 = vector.broadcast %221 : vector<8x1xf32> to vector<8x128xf32>
    %224 = vector.broadcast %222 : vector<1x128xf32> to vector<8x128xf32>
    %225 = arith.subf %223, %224 : vector<8x128xf32>
    %226 = math.absf %225 : vector<8x128xf32>
    %227 = arith.addf %220, %226 : vector<8x128xf32>
    %c8_i32 = arith.constant 8 : i32
    %228 = arith.muli %arg0, %c8_i32 : i32
    %229 = tpu.iota {dimensions = array<i32: 0>} : vector<8x128xi32>
    %230 = vector.broadcast %228 : i32 to vector<8x128xi32>
    %231 = arith.addi %230, %229 : vector<8x128xi32>
    %c128_i32 = arith.constant 128 : i32
    %232 = arith.muli %arg1, %c128_i32 : i32
    %233 = tpu.iota {dimensions = array<i32: 1>} : vector<8x128xi32>
    %234 = vector.broadcast %232 : i32 to vector<8x128xi32>
    %235 = arith.addi %234, %233 : vector<8x128xi32>
    %236 = arith.cmpi eq, %231, %235 : vector<8x128xi32>
    %cst_97 = arith.constant 1.000000e+06 : f32
    %237 = vector.broadcast %cst_97 : f32 to vector<8x128xf32>
    %238 = arith.select %236, %237, %227 : vector<8x128xi1>, vector<8x128xf32>
    %c8_i32_98 = arith.constant 8 : i32
    %239 = vector.broadcast %c8_i32_98 : i32 to vector<8x128xi32>
    %240 = arith.cmpi sge, %235, %239 : vector<8x128xi32>
    %cst_99 = arith.constant 3.40282347E+38 : f32
    %241 = vector.broadcast %cst_99 : f32 to vector<8x128xf32>
    %242 = arith.select %240, %241, %238 : vector<8x128xi1>, vector<8x128xf32>
    %cst_100 = arith.constant dense<0x7F800000> : vector<8xf32>
    %243 = vector.multi_reduction <minimumf>, %242, %cst_100 [1] : vector<8x128xf32> to vector<8xf32>
    %244 = vector.shape_cast %243 : vector<8xf32> to vector<8x1xf32>
    %c0_101 = arith.constant 0 : index
    %c0_102 = arith.constant 0 : index
    %245 = vector.load %arg5[%c0_101, %c0_102] : memref<8x1xf32, #tpu.memory_space<vmem>>, vector<8x1xf32>
    %246 = arith.minimumf %245, %244 : vector<8x1xf32>
    %c0_103 = arith.constant 0 : index
    %c0_104 = arith.constant 0 : index
    %247 = vector.load %arg5[%c0_103, %c0_104] : memref<8x1xf32, #tpu.memory_space<vmem>>, vector<8x1xf32>
    tpu.vector_store %arg5[%c0_103, %c0_104], %246 {strides = array<i32>} : memref<8x1xf32, #tpu.memory_space<vmem>>, vector<8x1xf32>,
    %c0_i32_105 = arith.constant 0 : i32
    %248 = arith.cmpi eq, %arg1, %c0_i32_105 : i32
    %249 = arith.extui %248 : i1 to i32
    %c0_i32_106 = arith.constant 0 : i32
    %250 = arith.cmpi ne, %249, %c0_i32_106 : i32
    scf.if %250 {
      %c8_i32_107 = arith.constant 8 : i32
      %251 = arith.muli %arg0, %c8_i32_107 : i32
      %252 = tpu.iota {dimensions = array<i32: 0>} : vector<8x1xi32>
      %253 = vector.broadcast %251 : i32 to vector<8x1xi32>
      %254 = arith.addi %253, %252 : vector<8x1xi32>
      %c0_108 = arith.constant 0 : index
      %c0_109 = arith.constant 0 : index
      %255 = vector.load %arg5[%c0_108, %c0_109] : memref<8x1xf32, #tpu.memory_space<vmem>>, vector<8x1xf32>
      %256 = math.log %255 : vector<8x1xf32>
      %c8_i32_110 = arith.constant 8 : i32
      %257 = vector.broadcast %c8_i32_110 : i32 to vector<8x1xi32>
      %258 = arith.cmpi slt, %254, %257 : vector<8x1xi32>
      %cst_111 = arith.constant 0.000000e+00 : f32
      %259 = vector.broadcast %cst_111 : f32 to vector<8x1xf32>
      %260 = arith.select %258, %256, %259 : vector<8x1xi1>, vector<8x1xf32>
      %c0_112 = arith.constant 0 : index
      %c0_113 = arith.constant 0 : index
      %261 = vector.load %arg4[%c0_112, %c0_113] : memref<8x1xf32, #tpu.memory_space<vmem>>, vector<8x1xf32>
      tpu.vector_store %arg4[%c0_112, %c0_113], %260 {strides = array<i32>} : memref<8x1xf32, #tpu.memory_space<vmem>>, vector<8x1xf32>,
    } else {
    }
    return
  }
  func.func @transform_0(%arg0: i32, %arg1: i32) -> (i32, i32) {
    %c0_i32 = arith.constant 0 : i32
    %c0_i32_0 = arith.constant 0 : i32
    return %arg0, %c0_i32 : i32, i32
  }
  func.func @transform_1(%arg0: i32, %arg1: i32) -> (i32, i32) {
    %c0_i32 = arith.constant 0 : i32
    %c0_i32_0 = arith.constant 0 : i32
    return %c0_i32, %arg1 : i32, i32
  }
  func.func @transform_2(%arg0: i32, %arg1: i32) -> (i32, i32) {
    %c0_i32 = arith.constant 0 : i32
    %c0_i32_0 = arith.constant 0 : i32
    return %arg0, %c0_i32 : i32, i32
  }
}

</mosaic_0001>

<bundles_post_ra>
// kernel: tpu_custom_call.1
= control target key start
LH: loop header
LB: loop body
LE: loop exit
PB: predicated region body
PF: predicated region fallthrough
CT: control target
= control target key end

     0   :  { %7 = vsyncpa [#allocation4], 0  ;;  %s739_s0 = inlined_call_operand.hbm [shape: f32[8,32], index: 0, kind: input, shape index: {}]   ;;  %s740_s1 = inlined_call_operand.hbm [shape: f32[32,128], index: 1, kind: input, shape index: {}]   ;;  %s741_s2 = inlined_call_operand.vmem [shape: f32[8,1], index: 2, kind: output, shape index: {}]  }
   0x1   :  { %8 = vsyncpa [#allocation6], 0  ;;  %s616_s9 = smov [#allocation3]   ;;  %s617_s11 = smov [#allocation5]  }
   0x2   :  { %s15_s10 = sshll.u32 %s616_s9, 4  ;;  %s24_s12 = sshll.u32 %s617_s11, 4  ;;  %s16_s10 = int_to_ptr.vmem [resolvable:$true] %s15_s10  ;;  %s668_s12 = int_to_ptr.vmem [resolvable:$true] %s24_s12 }
   0x3   :  { %s568_s15 = scalar_lea.hbm %s739_s0, 128 }
   0x4   :  { %p569_p0 = scmp.ne.s32.totalorder %s739_s0, %s568_s15  ;;  %p572_p1 = scmp.lt.u32.totalorder %s568_s15, %s739_s0 }
   0x6   :  { %p574_p2 = pnand %p572_p1, %p569_p0 }
   0x8   :  { %577 = shalt.err (!%p574_p2)
}
   0x9   :  { %s578_s20 = scalar_lea.vmem %s16_s10, 128  ;;  %p583_p4 = scmp.lt.s32.totalorder %s16_s10, %s16_s10 }
   0xa   :  { %p579_p3 = scmp.ne.s32.totalorder %s16_s10, %s578_s20  ;;  %p584_p5 = scmp.lt.s32.totalorder %s578_s20, %s578_s20 }
   0xc   :  { %p585_p6 = por %p584_p5, %p583_p4 }
   0xe   :  { %p586_p7 = pnand %p585_p6, %p579_p3 }
  0x10   :  { %589 = shalt.err (!%p586_p7)
}
  0x11   :  { %18 = dma.hbm_to_vmem [thread:$0]  %s739_s0, 128, %s16_s10, [#allocation4]  }
  0x12   :  { %s590_s25 = scalar_lea.hbm %s740_s1, 512 }
  0x13   :  { %p591_p8 = scmp.ne.s32.totalorder %s740_s1, %s590_s25  ;;  %p594_p9 = scmp.lt.u32.totalorder %s590_s25, %s740_s1 }
  0x15   :  { %p596_p10 = pnand %p594_p9, %p591_p8 }
  0x17   :  { %599 = shalt.err (!%p596_p10)
}
  0x18   :  { %s600_s30 = scalar_lea.vmem %s668_s12, 512  ;;  %p605_p12 = scmp.lt.s32.totalorder %s668_s12, %s668_s12 }
  0x19   :  { %p601_p11 = scmp.ne.s32.totalorder %s668_s12, %s600_s30  ;;  %p606_p13 = scmp.lt.s32.totalorder %s600_s30, %s600_s30 }
  0x1b   :  { %p607_p0 = por %p606_p13, %p605_p12 }
  0x1d   :  { %p608_p1 = pnand %p607_p0, %p601_p11 }
  0x1f   :  { %611 = shalt.err (!%p608_p1)
}
  0x20   :  { %s618_s0 = smov 128   ;;  %s619_s3 = smov 8  }
  0x21   :  { %30 = dma.hbm_to_vmem [thread:$0]  %s740_s1, 512, %s668_s12, [#allocation6], %s618_s0, %s618_s0, %s619_s3  }
  0x22   :  { %612 = dma.done.wait [#allocation4], 128  }
  0x23   :  { %613 = vsyncadd [#allocation4], 4294967168 }
  0x24   :  { %614 = dma.done.wait [#allocation6], 512  }
  0x25   :  { %615 = vsyncadd [#allocation6], 4294966784  ;;  %v620_v0 = vmov 2   ;;  %v621_v1 = vmov 0   ;;  %v699_v2 = vld [vmem:[#allocation3] sm:$0xff]  ;;  %v622_v3 = vmov 3  }
  0x26   :  { %535 = vset.pattern.permute.xlu1 %v620_v0  ;;  %533 = vset.pattern.permute.xlu0 %v621_v1  ;;  %v623_v4 = vmov 1   ;;  %v624_v5 = vmov 4   ;;  %v625_v6 = vmov 5   ;;  %v626_v7 = vmov 6   ;;  %v464_v34 = vld [vmem:[#allocation5] ss:$0 sm:$0xff] }
  0x27   :  { %71 = vperm.xlu1 %535, %v699_v2   ;;  %47 = vperm.xlu0 %533, %v699_v2   ;;  %v627_v8 = vmov 8   ;;  %v628_v9 = vmov 7   ;;  %v629_v10 = vmov 11   ;;  %v630_v11 = vmov 9   ;;  %v466_v38 = vld [vmem:[#allocation5 + $0x2] ss:$0 sm:$0xff] }
  0x28   :  { %v631_v12 = vmov 14   ;;  %v632_v13 = vmov 10   ;;  %v633_v14 = vmov 17   ;;  %v634_v15 = vmov 12   ;;  %v465_v39 = vld [vmem:[#allocation5 + $0x1] ss:$0 sm:$0xff] }
  0x29   :  { %v635_v16 = vmov 20   ;;  %v636_v17 = vmov 13   ;;  %v637_v18 = vmov 23   ;;  %v638_v19 = vmov 15   ;;  %v467_v40 = vld [vmem:[#allocation5 + $0x3] ss:$0 sm:$0xff] }
  0x2a   :  { %v639_v20 = vmov 26   ;;  %v640_v21 = vmov 16   ;;  %v641_v22 = vmov 29   ;;  %v642_v23 = vmov 18   ;;  %v468_v48 = vld [vmem:[#allocation5 + $0x4] ss:$0 sm:$0xff] }
  0x2b   :  { %536 = vset.pattern.permute.xlu1 %v622_v3  ;;  %534 = vset.pattern.permute.xlu0 %v623_v4  ;;  %v643_v24 = vmov 31   ;;  %v644_v25 = vmov 19   ;;  %v645_v26 = vmov 21   ;;  %v646_v27 = vmov 22   ;;  %v469_v49 = vld [vmem:[#allocation5 + $0x5] ss:$0 sm:$0xff] }
  0x2c   :  { %83 = vperm.xlu1 %536, %v699_v2   ;;  %59 = vperm.xlu0 %534, %v699_v2   ;;  %v647_v28 = vmov 24   ;;  %v648_v29 = vmov 25   ;;  %v649_v30 = vmov 27   ;;  %v650_v31 = vmov 28   ;;  %v470_v59 = vld [vmem:[#allocation5 + $0x6] ss:$0 sm:$0xff] }
  0x2d   :  { %v651_v32 = vmov 30   ;;  %vm41_vm0 = vcmask 7168   ;;  %v652_v33 = vmov 3.4028235e+38   ;;  %v471_v1 = vld [vmem:[#allocation5 + $0x7] ss:$0 sm:$0xff] }
  0x2e   :  { %42 = vst.msk [vmem:[#allocation2] sm:$0xff] %vm41_vm0, %v652_v33 }
  0x30   :  { %537 = vset.pattern.permute.xlu1 %v624_v5  ;;  %538 = vset.pattern.permute.xlu0 %v625_v6 }
  0x31   :  { %95 = vperm.xlu1 %537, %v699_v2   ;;  %107 = vperm.xlu0 %538, %v699_v2  }
  0x35   :  { %539 = vset.pattern.permute.xlu1 %v626_v7  ;;  %541 = vset.pattern.permute.xlu0 %v627_v8 }
  0x36   :  { %119 = vperm.xlu1 %539, %v699_v2   ;;  %143 = vperm.xlu0 %541, %v699_v2  }
  0x3a   :  { %540 = vset.pattern.permute.xlu1 %v628_v9  ;;  %544 = vset.pattern.permute.xlu0 %v629_v10 }
  0x3b   :  { %131 = vperm.xlu1 %540, %v699_v2   ;;  %179 = vperm.xlu0 %544, %v699_v2  }
  0x3f   :  { %542 = vset.pattern.permute.xlu1 %v630_v11  ;;  %547 = vset.pattern.permute.xlu0 %v631_v12  ;;  %v473_v11 = vld [vmem:[#allocation5 + $0x9] ss:$0 sm:$0xff] }
  0x40   :  { %155 = vperm.xlu1 %542, %v699_v2   ;;  %215 = vperm.xlu0 %547, %v699_v2  }
  0x44   :  { %543 = vset.pattern.permute.xlu1 %v632_v13  ;;  %550 = vset.pattern.permute.xlu0 %v633_v14 }
  0x45   :  { %167 = vperm.xlu1 %543, %v699_v2   ;;  %251 = vperm.xlu0 %550, %v699_v2  }
  0x49   :  { %545 = vset.pattern.permute.xlu1 %v634_v15  ;;  %553 = vset.pattern.permute.xlu0 %v635_v16  ;;  %v474_v16 = vld [vmem:[#allocation5 + $0xa] ss:$0 sm:$0xff] }
  0x4a   :  { %191 = vperm.xlu1 %545, %v699_v2   ;;  %287 = vperm.xlu0 %553, %v699_v2  }
  0x4e   :  { %546 = vset.pattern.permute.xlu1 %v636_v17  ;;  %556 = vset.pattern.permute.xlu0 %v637_v18  ;;  %v475_v17 = vld [vmem:[#allocation5 + $0xb] ss:$0 sm:$0xff] }
  0x4f   :  { %203 = vperm.xlu1 %546, %v699_v2   ;;  %323 = vperm.xlu0 %556, %v699_v2  }
  0x53   :  { %548 = vset.pattern.permute.xlu1 %v638_v19  ;;  %559 = vset.pattern.permute.xlu0 %v639_v20 }
  0x54   :  { %227 = vperm.xlu1 %548, %v699_v2   ;;  %359 = vperm.xlu0 %559, %v699_v2  }
  0x58   :  { %549 = vset.pattern.permute.xlu1 %v640_v21  ;;  %562 = vset.pattern.permute.xlu0 %v641_v22 }
  0x59   :  { %239 = vperm.xlu1 %549, %v699_v2   ;;  %395 = vperm.xlu0 %562, %v699_v2  }
  0x5d   :  { %551 = vset.pattern.permute.xlu1 %v642_v23  ;;  %565 = vset.pattern.permute.xlu0 %v643_v24 }
  0x5e   :  { %263 = vperm.xlu1 %551, %v699_v2  }
  0x62   :  { %552 = vset.pattern.permute.xlu1 %v644_v25 }
  0x63   :  { %275 = vperm.xlu1 %552, %v699_v2  }
  0x67   :  { %554 = vset.pattern.permute.xlu1 %v645_v26  ;;  %v476_v26 = vld [vmem:[#allocation5 + $0xc] ss:$0 sm:$0xff] }
  0x68   :  { %299 = vperm.xlu1 %554, %v699_v2  }
  0x6c   :  { %555 = vset.pattern.permute.xlu1 %v646_v27 }
  0x6d   :  { %311 = vperm.xlu1 %555, %v699_v2  }
  0x71   :  { %557 = vset.pattern.permute.xlu1 %v647_v28 }
  0x72   :  { %335 = vperm.xlu1 %557, %v699_v2  }
  0x76   :  { %558 = vset.pattern.permute.xlu1 %v648_v29 }
  0x77   :  { %347 = vperm.xlu1 %558, %v699_v2  }
  0x7b   :  { %560 = vset.pattern.permute.xlu1 %v649_v30 }
  0x7c   :  { %371 = vperm.xlu1 %560, %v699_v2  }
  0x80   :  { %561 = vset.pattern.permute.xlu1 %v650_v31  ;;  %v477_v31 = vld [vmem:[#allocation5 + $0xd] ss:$0 sm:$0xff] }
  0x81   :  { %383 = vperm.xlu1 %561, %v699_v2  }
  0x85   :  { %563 = vset.pattern.permute.xlu1 %v651_v32  ;;  %v478_v32 = vld [vmem:[#allocation5 + $0xe] ss:$0 sm:$0xff] }
  0x86   :  { %407 = vperm.xlu1 %563, %v699_v2  }
  0x8a   :  { %564 = vset.pattern.permute.xlu1 %v643_v24 }
  0x8b   :  { %419 = vperm.xlu1 %564, %v699_v2   ;;  %v472_v2 = vld [vmem:[#allocation5 + $0x8] ss:$0 sm:$0xff] }
  0xa6   :  { %v72_v35 = vpop.permute.xlu1 %71  ;;  %v48_v36 = vpop.permute.xlu0 %47 }
  0xa7   :  { %v54_v37 = vsub.f32 %v48_v36, %v464_v34  ;;  %v78_v43 = vsub.f32 %v72_v35, %v466_v38 }
  0xa9   :  { %v55_v44 = vand.u32 2147483647, %v54_v37  ;;  %v79_v50 = vand.u32 2147483647, %v78_v43 }
  0xab   :  { %v84_v41 = vpop.permute.xlu1 %83  ;;  %v60_v42 = vpop.permute.xlu0 %59 }
  0xac   :  { %v66_v45 = vsub.f32 %v60_v42, %v465_v39  ;;  %v90_v46 = vsub.f32 %v84_v41, %v467_v40  ;;  %v479_v41 = vld [vmem:[#allocation5 + $0xf] ss:$0 sm:$0xff] }
  0xae   :  { %v67_v47 = vand.u32 2147483647, %v66_v45  ;;  %v91_v56 = vand.u32 2147483647, %v90_v46  ;;  %v480_v46 = vld [vmem:[#allocation5 + $0x10] ss:$0 sm:$0xff] }
  0xb0   :  { %v68_v51 = vadd.f32 %v67_v47, %v55_v44  ;;  %v96_v52 = vpop.permute.xlu1 %95  ;;  %v108_v53 = vpop.permute.xlu0 %107  ;;  %v481_v47 = vld [vmem:[#allocation5 + $0x11] ss:$0 sm:$0xff] }
  0xb1   :  { %v102_v54 = vsub.f32 %v96_v52, %v468_v48  ;;  %v114_v55 = vsub.f32 %v108_v53, %v469_v49 }
  0xb2   :  { %v80_v57 = vadd.f32 %v79_v50, %v68_v51 }
  0xb3   :  { %v103_v58 = vand.u32 2147483647, %v102_v54  ;;  %v115_v61 = vand.u32 2147483647, %v114_v55 }
  0xb4   :  { %v92_v60 = vadd.f32 %v91_v56, %v80_v57  ;;  %v482_v56 = vld [vmem:[#allocation5 + $0x12] ss:$0 sm:$0xff] }
  0xb5   :  { %v120_v62 = vpop.permute.xlu1 %119  ;;  %v144_v3 = vpop.permute.xlu0 %143 }
  0xb6   :  { %v104_v63 = vadd.f32 %v103_v58, %v92_v60  ;;  %v126_v0 = vsub.f32 %v120_v62, %v470_v59  ;;  %v150_v8 = vsub.f32 %v144_v3, %v472_v2  ;;  %v484_v62 = vld [vmem:[#allocation5 + $0x14] ss:$0 sm:$0xff] }
  0xb8   :  { %v116_v4 = vadd.f32 %v115_v61, %v104_v63  ;;  %v127_v5 = vand.u32 2147483647, %v126_v0  ;;  %v151_v13 = vand.u32 2147483647, %v150_v8  ;;  %v483_v61 = vld [vmem:[#allocation5 + $0x13] ss:$0 sm:$0xff] }
  0xba   :  { %v132_v6 = vpop.permute.xlu1 %131  ;;  %v128_v9 = vadd.f32 %v127_v5, %v116_v4  ;;  %v180_v18 = vpop.permute.xlu0 %179 }
  0xbb   :  { %v138_v7 = vsub.f32 %v132_v6, %v471_v1  ;;  %v186_v23 = vsub.f32 %v180_v18, %v475_v17 }
  0xbd   :  { %v139_v10 = vand.u32 2147483647, %v138_v7  ;;  %v187_v28 = vand.u32 2147483647, %v186_v23  ;;  %v485_v7 = vld [vmem:[#allocation5 + $0x15] ss:$0 sm:$0xff] }
  0xbf   :  { %v140_v12 = vadd.f32 %v139_v10, %v128_v9  ;;  %v156_v14 = vpop.permute.xlu1 %155  ;;  %v216_v33 = vpop.permute.xlu0 %215 }
  0xc0   :  { %v162_v15 = vsub.f32 %v156_v14, %v473_v11  ;;  %v222_v38 = vsub.f32 %v216_v33, %v478_v32 }
  0xc1   :  { %v152_v19 = vadd.f32 %v151_v13, %v140_v12  ;;  %v486_v12 = vld [vmem:[#allocation5 + $0x16] ss:$0 sm:$0xff]  ;;  %v487_v13 = vld [vmem:[#allocation5 + $0x17] ss:$0 sm:$0xff] }
  0xc2   :  { %v163_v20 = vand.u32 2147483647, %v162_v15  ;;  %v223_v43 = vand.u32 2147483647, %v222_v38 }
  0xc4   :  { %v168_v21 = vpop.permute.xlu1 %167  ;;  %v164_v24 = vadd.f32 %v163_v20, %v152_v19  ;;  %v252_v48 = vpop.permute.xlu0 %251 }
  0xc5   :  { %v174_v22 = vsub.f32 %v168_v21, %v474_v16  ;;  %v258_v53 = vsub.f32 %v252_v48, %v481_v47 }
  0xc7   :  { %v175_v25 = vand.u32 2147483647, %v174_v22  ;;  %v259_v58 = vand.u32 2147483647, %v258_v53  ;;  %v488_v22 = vld [vmem:[#allocation5 + $0x18] ss:$0 sm:$0xff] }
  0xc9   :  { %v176_v27 = vadd.f32 %v175_v25, %v164_v24  ;;  %v192_v29 = vpop.permute.xlu1 %191  ;;  %v288_v63 = vpop.permute.xlu0 %287 }
  0xca   :  { %v198_v30 = vsub.f32 %v192_v29, %v476_v26  ;;  %v294_v4 = vsub.f32 %v288_v63, %v484_v62 }
  0xcb   :  { %v188_v34 = vadd.f32 %v187_v28, %v176_v27  ;;  %v489_v27 = vld [vmem:[#allocation5 + $0x19] ss:$0 sm:$0xff]  ;;  %v490_v28 = vld [vmem:[#allocation5 + $0x1a] ss:$0 sm:$0xff] }
  0xcc   :  { %v199_v35 = vand.u32 2147483647, %v198_v30  ;;  %v295_v9 = vand.u32 2147483647, %v294_v4 }
  0xce   :  { %v204_v36 = vpop.permute.xlu1 %203  ;;  %v200_v39 = vadd.f32 %v199_v35, %v188_v34  ;;  %v324_v14 = vpop.permute.xlu0 %323 }
  0xcf   :  { %v210_v37 = vsub.f32 %v204_v36, %v477_v31  ;;  %v330_v19 = vsub.f32 %v324_v14, %v487_v13 }
  0xd1   :  { %v211_v40 = vand.u32 2147483647, %v210_v37  ;;  %v331_v24 = vand.u32 2147483647, %v330_v19  ;;  %v491_v37 = vld [vmem:[#allocation5 + $0x1b] ss:$0 sm:$0xff] }
  0xd3   :  { %v212_v42 = vadd.f32 %v211_v40, %v200_v39  ;;  %v228_v44 = vpop.permute.xlu1 %227  ;;  %v360_v29 = vpop.permute.xlu0 %359 }
  0xd4   :  { %v234_v45 = vsub.f32 %v228_v44, %v479_v41  ;;  %v366_v34 = vsub.f32 %v360_v29, %v490_v28 }
  0xd5   :  { %v224_v49 = vadd.f32 %v223_v43, %v212_v42  ;;  %v492_v42 = vld [vmem:[#allocation5 + $0x1c] ss:$0 sm:$0xff]  ;;  %v493_v43 = vld [vmem:[#allocation5 + $0x1d] ss:$0 sm:$0xff] }
  0xd6   :  { %v235_v50 = vand.u32 2147483647, %v234_v45  ;;  %v367_v39 = vand.u32 2147483647, %v366_v34 }
  0xd8   :  { %v240_v51 = vpop.permute.xlu1 %239  ;;  %v236_v54 = vadd.f32 %v235_v50, %v224_v49  ;;  %v396_v44 = vpop.permute.xlu0 %395 }
  0xd9   :  { %v246_v52 = vsub.f32 %v240_v51, %v480_v46  ;;  %v402_v49 = vsub.f32 %v396_v44, %v493_v43 }
  0xdb   :  { %v247_v55 = vand.u32 2147483647, %v246_v52  ;;  %v494_v52 = vld [vmem:[#allocation5 + $0x1e] ss:$0 sm:$0xff] }
  0xdd   :  { %v248_v57 = vadd.f32 %v247_v55, %v236_v54  ;;  %v264_v59 = vpop.permute.xlu1 %263  ;;  %v403_v54 = vand.u32 2147483647, %v402_v49 }
  0xde   :  { %v270_v60 = vsub.f32 %v264_v59, %v482_v56 }
  0xdf   :  { %v260_v0 = vadd.f32 %v259_v58, %v248_v57  ;;  %v430_v57 = vlaneseq  ;;  %v495_v58 = vld [vmem:[#allocation5 + $0x1f] ss:$0 sm:$0xff] }
  0xe0   :  { %v271_v1 = vand.u32 2147483647, %v270_v60 }
  0xe1   :  { %v431_v62 = vshrl.u32 %v430_v57, 7  ;;  %v436_v63 = vand.u32 127, %v430_v57 }
  0xe2   :  { %v276_v2 = vpop.permute.xlu1 %275  ;;  %v272_v5 = vadd.f32 %v271_v1, %v260_v0 }
  0xe3   :  { %v282_v3 = vsub.f32 %v276_v2, %v483_v61  ;;  %vm439_vm1 = vcmp.eq.s32.totalorder %v431_v62, %v436_v63  ;;  %vm441_vm2 = vcmp.ge.s32.totalorder %v436_v63, 8 }
  0xe5   :  { %v283_v6 = vand.u32 2147483647, %v282_v3 }
  0xe7   :  { %v284_v8 = vadd.f32 %v283_v6, %v272_v5  ;;  %v300_v10 = vpop.permute.xlu1 %299  ;;  %v445_v6 = vld [vmem:[#allocation2] sm:$0xff] }
  0xe8   :  { %v306_v11 = vsub.f32 %v300_v10, %v485_v7 }
  0xe9   :  { %v296_v15 = vadd.f32 %v295_v9, %v284_v8 }
  0xea   :  { %v307_v16 = vand.u32 2147483647, %v306_v11 }
  0xec   :  { %v312_v17 = vpop.permute.xlu1 %311  ;;  %v308_v20 = vadd.f32 %v307_v16, %v296_v15 }
  0xed   :  { %v318_v18 = vsub.f32 %v312_v17, %v486_v12 }
  0xef   :  { %v319_v21 = vand.u32 2147483647, %v318_v18 }
  0xf1   :  { %v320_v23 = vadd.f32 %v319_v21, %v308_v20  ;;  %v336_v25 = vpop.permute.xlu1 %335 }
  0xf2   :  { %v342_v26 = vsub.f32 %v336_v25, %v488_v22 }
  0xf3   :  { %v332_v30 = vadd.f32 %v331_v24, %v320_v23 }
  0xf4   :  { %v343_v31 = vand.u32 2147483647, %v342_v26 }
  0xf6   :  { %v348_v32 = vpop.permute.xlu1 %347  ;;  %v344_v35 = vadd.f32 %v343_v31, %v332_v30 }
  0xf7   :  { %v354_v33 = vsub.f32 %v348_v32, %v489_v27 }
  0xf9   :  { %v355_v36 = vand.u32 2147483647, %v354_v33 }
  0xfb   :  { %v356_v38 = vadd.f32 %v355_v36, %v344_v35  ;;  %v372_v40 = vpop.permute.xlu1 %371 }
  0xfc   :  { %v378_v41 = vsub.f32 %v372_v40, %v491_v37 }
  0xfd   :  { %v368_v45 = vadd.f32 %v367_v39, %v356_v38 }
  0xfe   :  { %v379_v46 = vand.u32 2147483647, %v378_v41 }
 0x100   :  { %v384_v47 = vpop.permute.xlu1 %383  ;;  %v380_v50 = vadd.f32 %v379_v46, %v368_v45 }
 0x101   :  { %v390_v48 = vsub.f32 %v384_v47, %v492_v42 }
 0x103   :  { %v391_v51 = vand.u32 2147483647, %v390_v48 }
 0x105   :  { %v392_v53 = vadd.f32 %v391_v51, %v380_v50  ;;  %v408_v55 = vpop.permute.xlu1 %407 }
 0x106   :  { %v414_v56 = vsub.f32 %v408_v55, %v494_v52 }
 0x107   :  { %v404_v59 = vadd.f32 %v403_v54, %v392_v53 }
 0x108   :  { %v415_v60 = vand.u32 2147483647, %v414_v56 }
 0x10a   :  { %v420_v61 = vpop.permute.xlu1 %419  ;;  %v416_v1 = vadd.f32 %v415_v60, %v404_v59 }
 0x10b   :  { %v426_v0 = vsub.f32 %v420_v61, %v495_v58 }
 0x10d   :  { %v427_v2 = vand.u32 2147483647, %v426_v0 }
 0x10f   :  { %v428_v3 = vadd.f32 %v427_v2, %v416_v1 }
 0x111   :  { %v440_v4 = vsel %vm439_vm1, 1000000.0, %v428_v3 }
 0x112   :  { %v442_v5 = vsel %vm441_vm2, 3.4028235e+38, %v440_v4 }
 0x113   :  { %443 = vmin.xlane.f32.xlu0 %v442_v5 }
 0x1a0   :  { %v444_v7 = vpop.xlane.xlu0 %443 }
 0x1a1   :  { %v446_v8 = vmin.f32 %v445_v6, %v444_v7 }
 0x1a3   :  { %448 = vst.msk [vmem:[#allocation2] sm:$0xff] %vm41_vm0, %v446_v8 }
 0x1aa   :  { %v452_v9 = vld [vmem:[#allocation2] sm:$0xff] }
 0x1ab   :  { %566 = vlog2.f32 %v452_v9 }
 0x1b5   :  { %v567_v10 = vpop.eup %566 }
 0x1b6   :  { %v454_v11 = vmul.f32 0.6931472, %v567_v10 }
 0x1b8   :  { %457 = vst.msk [vmem:[%s741_s2] sm:$0xff] %vm41_vm0, %v454_v11 }
 0x1b9   :  { %462 = vsyncpa [#allocation4], 1 }
 0x1ba   :  { %463 = vsyncpa [#allocation6], 1 }

</bundles_post_ra>
